<compile_context>
chip_gen: v6e
topology: v6e:2x2x1
jax: 0.10.0
libtpu: 0.0.40
codegen_flags: <defaults>
</compile_context>

<pallas_src>
import jax
import jax.numpy as jnp
from jax.experimental import pallas as pl
from jax.experimental.pallas import tpu as pltpu


# ----------------------------------- fused Pallas kernel ----------------------
def _diffusion_policy_kernel(times_ref,                 # SMEM (B,) f32
                             img_ref, noise_ref,        # VMEM (B, C, HW) f32
                             slabA_ref, slabB_ref,      # VMEM packed weights
                             out_ref):                  # SMEM (1, 1) f32
    B, C, HW = img_ref.shape
    BHW = B * HW
    Hd = slabA_ref.shape[0]

    # ---- packed weights: static slices of two slabs, bf16 for the MXU only ----
    slabA = slabA_ref[...]                                   # (Hd, C+2 + Hd + C)
    w1aug = slabA[:, 0:C + 2].astype(jnp.bfloat16)           # [w1a^T | b1^T | wt^T]
    wlT = slabA[:, C + 2:C + 2 + Hd].astype(jnp.bfloat16)    # (Hd, Hd)
    w1bT = slabA[:, C + 2 + Hd:C + 2 + Hd + C].astype(jnp.bfloat16)  # (Hd, C)
    slabB = slabB_ref[...]                                   # (C, Hd + 1)
    w2T = slabB[:, 0:Hd].astype(jnp.bfloat16)                # (C, Hd)
    b2T = slabB[:, Hd:Hd + 1]                                # (C, 1) f32 broadcast add

    # ---- batch merged onto the lane axis: (C, B*HW); HW is a multiple of 128 ----
    img = jnp.concatenate([img_ref[b] for b in range(B)], axis=1)      # (C, BHW)
    noise = jnp.concatenate([noise_ref[b] for b in range(B)], axis=1)  # (C, BHW)

    # per-lane time row (constant within each batch's HW lane block)
    t_row = jnp.concatenate(
        [jnp.full((1, HW), times_ref[b], jnp.float32) for b in range(B)], axis=1)
    ones_row = jnp.ones((1, BHW), jnp.float32)

    # sigmoid noise schedule (start=-3, end=3, tau=1), computed in-kernel on one row
    v_start = jax.nn.sigmoid(jnp.float32(-3.0))
    v_end = jax.nn.sigmoid(jnp.float32(3.0))
    gamma = (v_end - jax.nn.sigmoid(t_row * 6.0 - 3.0)) / (v_end - v_start)
    gamma = jnp.clip(gamma, 1e-9, 1.0)
    alpha = jnp.sqrt(gamma)                                  # scale = 1.0
    sigma = jnp.sqrt(1.0 - gamma)                            # (1, BHW) rows

    # normalize_img (x*2-1) and forward diffusion q(x_t | x_0); f32 elementwise
    img_n = img * 2.0 - 1.0
    noised = alpha * img_n + sigma * noise                   # (C, BHW)

    # augmented contraction input folds b1 and t*wt into the first matmul
    x_aug = jnp.concatenate([noised, ones_row, t_row], axis=0).astype(jnp.bfloat16)

    # ---- model pass 1 (self_cond = latents = None) ----
    lin1 = jnp.dot(w1aug, x_aug, preferred_element_type=jnp.float32)   # (Hd, BHW)
    h1 = jnp.maximum(lin1, 0.0)
    out1 = jnp.dot(w2T, h1.astype(jnp.bfloat16),
                   preferred_element_type=jnp.float32) + b2T           # (C, BHW)

    # objective 'v': x_start = alpha * x_t - sigma * v, clamped to [-1, 1]
    self_cond = jnp.clip(alpha * noised - sigma * out1, -1.0, 1.0)

    # ---- model pass 2 (self_cond, self_latents = h1); reuse lin1, two aligned dots
    lin2 = (lin1
            + jnp.dot(wlT, h1.astype(jnp.bfloat16), preferred_element_type=jnp.float32)
            + jnp.dot(w1bT, self_cond.astype(jnp.bfloat16),
                      preferred_element_type=jnp.float32))
    h2 = jnp.maximum(lin2, 0.0)
    pred = jnp.dot(w2T, h2.astype(jnp.bfloat16),
                   preferred_element_type=jnp.float32) + b2T           # (C, BHW)

    # v-objective target; mean_b(per-sample MSE) == global mean over the (C, BHW) slab
    target = alpha * noise - sigma * img_n
    diff = pred - target
    mean_loss = jnp.mean(diff * diff)

    # min-SNR weight for 'v': min(snr,5)/(snr+1) == min(alpha^2, 5*sigma^2)
    # (division-free form; valid only because scale == 1.0 -> alpha^2 + sigma^2 = 1)
    weight_row = jnp.minimum(alpha * alpha, 5.0 * sigma * sigma)       # (1, BHW)
    mean_weight = jnp.mean(weight_row)

    # PyTorch broadcasting quirk: loss (b,) * loss_weight (b,1,1,1) -> (b,1,1,b);
    # .mean() over that outer product == mean(loss) * mean(weight).
    out_ref[0, 0] = mean_loss * mean_weight


# ----------------------------------- weight packing (one-time) -----------------
def pack_params(params):
    """Pre-pack weights into two lane-packed slabs. Call ONCE, outside the per-step jit."""
    w1a, w1b, b1, wt, wl, w2, b2 = params
    # slab A (Hd rows): [w1a^T | b1^T | wt^T | wl^T | w1b^T]  -> (Hd, C+2+Hd+C)
    slabA = jnp.concatenate([w1a.T, b1.T, wt.T, wl.T, w1b.T], axis=1).astype(jnp.float32)
    # slab B (C rows):  [w2^T | b2^T]                          -> (C, Hd+1)
    slabB = jnp.concatenate([w2.T, b2.T], axis=1).astype(jnp.float32)
    return slabA, slabB


# ----------------------------------- wrapper -----------------------------------
def diffusion_policy_forward(img_nchw, noise_nchw, times, slabA, slabB):
    B, C, H, W = img_nchw.shape
    HW = H * W
    # NCHW -> (B, C, HW): contiguous reshape, no transpose pass over HBM.
    img = img_nchw.reshape(B, C, HW).astype(jnp.float32)
    noise = noise_nchw.reshape(B, C, HW).astype(jnp.float32)

    smem = pl.BlockSpec(memory_space=pltpu.MemorySpace.SMEM)
    vmem = pl.BlockSpec(memory_space=pltpu.MemorySpace.VMEM)

    # No grid: the whole problem (< 100 KB) is VMEM-resident for one invocation.
    out = pl.pallas_call(
        _diffusion_policy_kernel,
        out_shape=jax.ShapeDtypeStruct((1, 1), jnp.float32),
        in_specs=[smem, vmem, vmem, vmem, vmem],
        out_specs=smem,
    )(times.astype(jnp.float32), img, noise, slabA, slabB)
    return out[0, 0]


# ----------------------------------- pure-JAX reference ------------------------
def _sigmoid_schedule_ref(t, start=-3.0, end=3.0, tau=1.0, clamp_min=1e-9):
    v_start = jax.nn.sigmoid(jnp.asarray(start / tau, jnp.float32))
    v_end = jax.nn.sigmoid(jnp.asarray(end / tau, jnp.float32))
    gamma = (-jax.nn.sigmoid((t * (end - start) + start) / tau) + v_end) / (v_end - v_start)
    return jnp.clip(gamma, clamp_min, 1.0)


def _reference(img_nchw, noise_nchw, times, params):
    B, C, H, W = img_nchw.shape
    img = jnp.transpose(img_nchw.reshape(B, C, H * W), (0, 2, 1))
    noise = jnp.transpose(noise_nchw.reshape(B, C, H * W), (0, 2, 1))
    gamma = _sigmoid_schedule_ref(times)
    alpha = jnp.sqrt(gamma)[:, None, None]
    sigma = jnp.sqrt(1.0 - gamma)[:, None, None]
    w1a, w1b, b1, wt, wl, w2, b2 = params

    img_n = img * 2.0 - 1.0
    noised = alpha * img_n + sigma * noise
    t = times[:, None, None]

    h1 = jax.nn.relu(noised @ w1a + b1 + t * wt)
    out1 = h1 @ w2 + b2
    self_cond = jnp.clip(alpha * noised - sigma * out1, -1.0, 1.0)
    h2 = jax.nn.relu(noised @ w1a + self_cond @ w1b + h1 @ wl + b1 + t * wt)
    pred = h2 @ w2 + b2

    target = alpha * noise - sigma * img_n
    loss = jnp.mean((pred - target) ** 2, axis=(1, 2))
    snr = (alpha * alpha / (sigma * sigma))[:, 0, 0]
    weight = jnp.minimum(snr, 5.0) / (snr + 1.0)
    return jnp.mean(loss) * jnp.mean(weight)


# ----------------------------------- main --------------------------------------
if __name__ == "__main__":
    B, C, H, W = 2, 4, 16, 16
    HIDDEN = 32

    key = jax.random.PRNGKey(0)
    (k_img, k_noise, k_times,
     k_w1a, k_w1b, k_b1, k_wt, k_wl, k_w2, k_b2) = jax.random.split(key, 10)

    img = jax.random.uniform(k_img, (B, C, H, W), jnp.float32)       # image in [0, 1]
    noise = jax.random.normal(k_noise, (B, C, H, W), jnp.float32)    # torch.randn_like
    times = jax.random.uniform(k_times, (B,), jnp.float32)           # uniform_(0, 1)
    # TODO(synk): host-side `random() < train_prob_self_cond` Bernoulli is fixed to True
    #             (prob 0.9) so the self-conditioning branch is always taken.

    params = (
        0.3 * jax.random.normal(k_w1a, (C, HIDDEN), jnp.float32),
        0.3 * jax.random.normal(k_w1b, (C, HIDDEN), jnp.float32),
        0.1 * jax.random.normal(k_b1, (1, HIDDEN), jnp.float32),
        0.1 * jax.random.normal(k_wt, (1, HIDDEN), jnp.float32),
        0.1 * jax.random.normal(k_wl, (HIDDEN, HIDDEN), jnp.float32),
        0.3 * jax.random.normal(k_w2, (HIDDEN, C), jnp.float32),
        0.1 * jax.random.normal(k_b2, (1, C), jnp.float32),
    )

    # One-time weight packing (kept out of the per-step jitted function).
    slabA, slabB = pack_params(params)

    fwd = jax.jit(diffusion_policy_forward)
    out = fwd(img, noise, times, slabA, slabB)
    out = jax.block_until_ready(out)

    ref = _reference(img, noise, times, params)
    assert jnp.isfinite(out), "kernel produced non-finite loss"
    # bf16 MXU operands (f32 accumulation) -> slightly looser tolerance than pure f32.
    assert jnp.allclose(out, ref, rtol=2e-2, atol=1e-3), (out, ref)

    print("KERNEL_OK")
</pallas_src>

<mosaic_0001>
module attributes {stable_mosaic.version = 11 : i64} {
  func.func @_diffusion_policy_kernel(%arg0: memref<2xf32, #tpu.memory_space<smem>>, %arg1: memref<2x4x256xf32, #tpu.memory_space<vmem>>, %arg2: memref<2x4x256xf32, #tpu.memory_space<vmem>>, %arg3: memref<32x42xf32, #tpu.memory_space<vmem>>, %arg4: memref<4x33xf32, #tpu.memory_space<vmem>>, %arg5: memref<1x1xf32, #tpu.memory_space<smem>>) attributes {dimension_semantics = [], scalar_prefetch = 0 : i64, scratch_operands = 0 : i64, tpu.core_type = #tpu.core_type<tc>} {
    %c0 = arith.constant 0 : index
    %c0_0 = arith.constant 0 : index
    %0 = vector.load %arg3[%c0, %c0_0] : memref<32x42xf32, #tpu.memory_space<vmem>>, vector<32x42xf32>
    %1 = vector.extract_strided_slice %0 {offsets = [0, 0], sizes = [32, 6], strides = [1, 1]} : vector<32x42xf32> to vector<32x6xf32>
    %2 = arith.truncf %1 : vector<32x6xf32> to vector<32x6xbf16>
    %3 = vector.extract_strided_slice %0 {offsets = [0, 6], sizes = [32, 32], strides = [1, 1]} : vector<32x42xf32> to vector<32x32xf32>
    %4 = arith.truncf %3 : vector<32x32xf32> to vector<32x32xbf16>
    %5 = vector.extract_strided_slice %0 {offsets = [0, 38], sizes = [32, 4], strides = [1, 1]} : vector<32x42xf32> to vector<32x4xf32>
    %6 = arith.truncf %5 : vector<32x4xf32> to vector<32x4xbf16>
    %c0_1 = arith.constant 0 : index
    %c0_2 = arith.constant 0 : index
    %7 = vector.load %arg4[%c0_1, %c0_2] : memref<4x33xf32, #tpu.memory_space<vmem>>, vector<4x33xf32>
    %8 = vector.extract_strided_slice %7 {offsets = [0, 0], sizes = [4, 32], strides = [1, 1]} : vector<4x33xf32> to vector<4x32xf32>
    %9 = arith.truncf %8 : vector<4x32xf32> to vector<4x32xbf16>
    %10 = vector.extract_strided_slice %7 {offsets = [0, 32], sizes = [4, 1], strides = [1, 1]} : vector<4x33xf32> to vector<4x1xf32>
    %c0_3 = arith.constant 0 : index
    %c0_4 = arith.constant 0 : index
    %c0_5 = arith.constant 0 : index
    %11 = vector.load %arg1[%c0_3, %c0_4, %c0_5] : memref<2x4x256xf32, #tpu.memory_space<vmem>>, vector<1x4x256xf32>
    %12 = vector.shape_cast %11 : vector<1x4x256xf32> to vector<4x256xf32>
    %c1 = arith.constant 1 : index
    %c0_6 = arith.constant 0 : index
    %c0_7 = arith.constant 0 : index
    %13 = vector.load %arg1[%c1, %c0_6, %c0_7] : memref<2x4x256xf32, #tpu.memory_space<vmem>>, vector<1x4x256xf32>
    %14 = vector.shape_cast %13 : vector<1x4x256xf32> to vector<4x256xf32>
    %15 = tpu.concatenate %12, %14 in 1 : vector<4x256xf32>, vector<4x256xf32> -> vector<4x512xf32>
    %c0_8 = arith.constant 0 : index
    %c0_9 = arith.constant 0 : index
    %c0_10 = arith.constant 0 : index
    %16 = vector.load %arg2[%c0_8, %c0_9, %c0_10] : memref<2x4x256xf32, #tpu.memory_space<vmem>>, vector<1x4x256xf32>
    %17 = vector.shape_cast %16 : vector<1x4x256xf32> to vector<4x256xf32>
    %c1_11 = arith.constant 1 : index
    %c0_12 = arith.constant 0 : index
    %c0_13 = arith.constant 0 : index
    %18 = vector.load %arg2[%c1_11, %c0_12, %c0_13] : memref<2x4x256xf32, #tpu.memory_space<vmem>>, vector<1x4x256xf32>
    %19 = vector.shape_cast %18 : vector<1x4x256xf32> to vector<4x256xf32>
    %20 = tpu.concatenate %17, %19 in 1 : vector<4x256xf32>, vector<4x256xf32> -> vector<4x512xf32>
    %c0_14 = arith.constant 0 : index
    %21 = memref.load %arg0[%c0_14] : memref<2xf32, #tpu.memory_space<smem>>
    %22 = vector.broadcast %21 : f32 to vector<1x256xf32>
    %c1_15 = arith.constant 1 : index
    %23 = memref.load %arg0[%c1_15] : memref<2xf32, #tpu.memory_space<smem>>
    %24 = vector.broadcast %23 : f32 to vector<1x256xf32>
    %25 = tpu.concatenate %22, %24 in 1 : vector<1x256xf32>, vector<1x256xf32> -> vector<1x512xf32>
    %cst = arith.constant 1.000000e+00 : f32
    %26 = vector.broadcast %cst : f32 to vector<1x512xf32>
    %cst_16 = arith.constant -3.000000e+00 : f32
    %27 = arith.negf %cst_16 : f32
    %28 = math.exp %27 : f32
    %cst_17 = arith.constant 1.000000e+00 : f32
    %29 = arith.addf %cst_17, %28 : f32
    %30 = arith.divf %cst_17, %29 : f32
    %cst_18 = arith.constant 3.000000e+00 : f32
    %31 = arith.negf %cst_18 : f32
    %32 = math.exp %31 : f32
    %cst_19 = arith.constant 1.000000e+00 : f32
    %33 = arith.addf %cst_19, %32 : f32
    %34 = arith.divf %cst_19, %33 : f32
    %cst_20 = arith.constant 6.000000e+00 : f32
    %35 = vector.broadcast %cst_20 : f32 to vector<1x512xf32>
    %36 = arith.mulf %25, %35 : vector<1x512xf32>
    %cst_21 = arith.constant 3.000000e+00 : f32
    %37 = vector.broadcast %cst_21 : f32 to vector<1x512xf32>
    %38 = arith.subf %36, %37 : vector<1x512xf32>
    %39 = arith.negf %38 : vector<1x512xf32>
    %40 = math.exp %39 : vector<1x512xf32>
    %cst_22 = arith.constant 1.000000e+00 : f32
    %41 = vector.broadcast %cst_22 : f32 to vector<1x512xf32>
    %42 = arith.addf %41, %40 : vector<1x512xf32>
    %43 = arith.divf %41, %42 : vector<1x512xf32>
    %44 = vector.broadcast %34 : f32 to vector<1x512xf32>
    %45 = arith.subf %44, %43 : vector<1x512xf32>
    %46 = arith.subf %34, %30 : f32
    %47 = vector.broadcast %46 : f32 to vector<1x512xf32>
    %48 = arith.divf %45, %47 : vector<1x512xf32>
    %cst_23 = arith.constant 9.99999971E-10 : f32
    %cst_24 = arith.constant 1.000000e+00 : f32
    %49 = vector.broadcast %cst_23 : f32 to vector<1x512xf32>
    %50 = arith.maximumf %49, %48 : vector<1x512xf32>
    %51 = vector.broadcast %cst_24 : f32 to vector<1x512xf32>
    %52 = arith.minimumf %51, %50 : vector<1x512xf32>
    %53 = math.sqrt %52 : vector<1x512xf32>
    %cst_25 = arith.constant 1.000000e+00 : f32
    %54 = vector.broadcast %cst_25 : f32 to vector<1x512xf32>
    %55 = arith.subf %54, %52 : vector<1x512xf32>
    %56 = math.sqrt %55 : vector<1x512xf32>
    %cst_26 = arith.constant 2.000000e+00 : f32
    %57 = vector.broadcast %cst_26 : f32 to vector<4x512xf32>
    %58 = arith.mulf %15, %57 : vector<4x512xf32>
    %cst_27 = arith.constant 1.000000e+00 : f32
    %59 = vector.broadcast %cst_27 : f32 to vector<4x512xf32>
    %60 = arith.subf %58, %59 : vector<4x512xf32>
    %61 = vector.broadcast %53 : vector<1x512xf32> to vector<4x512xf32>
    %62 = arith.mulf %61, %60 : vector<4x512xf32>
    %63 = vector.broadcast %56 : vector<1x512xf32> to vector<4x512xf32>
    %64 = arith.mulf %63, %20 : vector<4x512xf32>
    %65 = arith.addf %62, %64 : vector<4x512xf32>
    %66 = tpu.concatenate %65, %26, %25 in 0 : vector<4x512xf32>, vector<1x512xf32>, vector<1x512xf32> -> vector<6x512xf32>
    %67 = arith.truncf %66 : vector<6x512xf32> to vector<6x512xbf16>
    %cst_28 = arith.constant dense<0.000000e+00> : vector<32x512xf32>
    %68 = tpu.matmul %2, %67, %cst_28 {dimension_numbers = #tpu.dot_dimension_numbers<[1], [0], [0], [1], [0, 0, 1, 1], [], []>} : vector<32x6xbf16>, vector<6x512xbf16>, vector<32x512xf32> -> vector<32x512xf32>
    %cst_29 = arith.constant 0.000000e+00 : f32
    %69 = vector.broadcast %cst_29 : f32 to vector<32x512xf32>
    %70 = arith.maximumf %68, %69 : vector<32x512xf32>
    %71 = arith.truncf %70 : vector<32x512xf32> to vector<32x512xbf16>
    %cst_30 = arith.constant dense<0.000000e+00> : vector<4x512xf32>
    %72 = tpu.matmul %9, %71, %cst_30 {dimension_numbers = #tpu.dot_dimension_numbers<[1], [0], [0], [1], [0, 0, 1, 1], [], []>} : vector<4x32xbf16>, vector<32x512xbf16>, vector<4x512xf32> -> vector<4x512xf32>
    %73 = vector.broadcast %10 : vector<4x1xf32> to vector<4x512xf32>
    %74 = arith.addf %72, %73 : vector<4x512xf32>
    %75 = vector.broadcast %53 : vector<1x512xf32> to vector<4x512xf32>
    %76 = arith.mulf %75, %65 : vector<4x512xf32>
    %77 = vector.broadcast %56 : vector<1x512xf32> to vector<4x512xf32>
    %78 = arith.mulf %77, %74 : vector<4x512xf32>
    %79 = arith.subf %76, %78 : vector<4x512xf32>
    %cst_31 = arith.constant -1.000000e+00 : f32
    %cst_32 = arith.constant 1.000000e+00 : f32
    %80 = vector.broadcast %cst_31 : f32 to vector<4x512xf32>
    %81 = arith.maximumf %80, %79 : vector<4x512xf32>
    %82 = vector.broadcast %cst_32 : f32 to vector<4x512xf32>
    %83 = arith.minimumf %82, %81 : vector<4x512xf32>
    %84 = arith.truncf %70 : vector<32x512xf32> to vector<32x512xbf16>
    %cst_33 = arith.constant dense<0.000000e+00> : vector<32x512xf32>
    %85 = tpu.matmul %4, %84, %cst_33 {dimension_numbers = #tpu.dot_dimension_numbers<[1], [0], [0], [1], [0, 0, 1, 1], [], []>} : vector<32x32xbf16>, vector<32x512xbf16>, vector<32x512xf32> -> vector<32x512xf32>
    %86 = arith.addf %68, %85 : vector<32x512xf32>
    %87 = arith.truncf %83 : vector<4x512xf32> to vector<4x512xbf16>
    %cst_34 = arith.constant dense<0.000000e+00> : vector<32x512xf32>
    %88 = tpu.matmul %6, %87, %cst_34 {dimension_numbers = #tpu.dot_dimension_numbers<[1], [0], [0], [1], [0, 0, 1, 1], [], []>} : vector<32x4xbf16>, vector<4x512xbf16>, vector<32x512xf32> -> vector<32x512xf32>
    %89 = arith.addf %86, %88 : vector<32x512xf32>
    %cst_35 = arith.constant 0.000000e+00 : f32
    %90 = vector.broadcast %cst_35 : f32 to vector<32x512xf32>
    %91 = arith.maximumf %89, %90 : vector<32x512xf32>
    %92 = arith.truncf %91 : vector<32x512xf32> to vector<32x512xbf16>
    %cst_36 = arith.constant dense<0.000000e+00> : vector<4x512xf32>
    %93 = tpu.matmul %9, %92, %cst_36 {dimension_numbers = #tpu.dot_dimension_numbers<[1], [0], [0], [1], [0, 0, 1, 1], [], []>} : vector<4x32xbf16>, vector<32x512xbf16>, vector<4x512xf32> -> vector<4x512xf32>
    %94 = vector.broadcast %10 : vector<4x1xf32> to vector<4x512xf32>
    %95 = arith.addf %93, %94 : vector<4x512xf32>
    %96 = vector.broadcast %53 : vector<1x512xf32> to vector<4x512xf32>
    %97 = arith.mulf %96, %20 : vector<4x512xf32>
    %98 = vector.broadcast %56 : vector<1x512xf32> to vector<4x512xf32>
    %99 = arith.mulf %98, %60 : vector<4x512xf32>
    %100 = arith.subf %97, %99 : vector<4x512xf32>
    %101 = arith.subf %95, %100 : vector<4x512xf32>
    %102 = arith.mulf %101, %101 : vector<4x512xf32>
    %103 = vector.shape_cast %102 : vector<4x512xf32> to vector<1x4x512xf32>
    %cst_37 = arith.constant dense<0.000000e+00> : vector<1xf32>
    %104 = vector.multi_reduction <add>, %103, %cst_37 [1, 2] : vector<1x4x512xf32> to vector<1xf32>
    %105 = vector.shape_cast %104 : vector<1xf32> to vector<1x1x1xf32>
    %106 = vector.extract %105[0, 0, 0] : f32 from vector<1x1x1xf32>
    %cst_38 = arith.constant 2.048000e+03 : f32
    %107 = arith.divf %106, %cst_38 : f32
    %108 = arith.mulf %53, %53 : vector<1x512xf32>
    %cst_39 = arith.constant 5.000000e+00 : f32
    %109 = vector.broadcast %cst_39 : f32 to vector<1x512xf32>
    %110 = arith.mulf %109, %56 : vector<1x512xf32>
    %111 = arith.mulf %110, %56 : vector<1x512xf32>
    %112 = arith.minimumf %108, %111 : vector<1x512xf32>
    %113 = vector.shape_cast %112 : vector<1x512xf32> to vector<1x1x512xf32>
    %cst_40 = arith.constant dense<0.000000e+00> : vector<1xf32>
    %114 = vector.multi_reduction <add>, %113, %cst_40 [1, 2] : vector<1x1x512xf32> to vector<1xf32>
    %115 = vector.shape_cast %114 : vector<1xf32> to vector<1x1x1xf32>
    %116 = vector.extract %115[0, 0, 0] : f32 from vector<1x1x1xf32>
    %cst_41 = arith.constant 5.120000e+02 : f32
    %117 = arith.divf %116, %cst_41 : f32
    %118 = arith.mulf %107, %117 : f32
    %c0_42 = arith.constant 0 : index
    %c0_43 = arith.constant 0 : index
    %119 = memref.load %arg5[%c0_42, %c0_43] : memref<1x1xf32, #tpu.memory_space<smem>>
    memref.store %118, %arg5[%c0_42, %c0_43] : memref<1x1xf32, #tpu.memory_space<smem>>
    return
  }
}

</mosaic_0001>

<bundles_post_ra>
// kernel: diffusion_policy_forward.1
= control target key start
LH: loop header
LB: loop body
LE: loop exit
PB: predicated region body
PF: predicated region fallthrough
CT: control target
= control target key end

     0   :  { %10 = vsyncpa [#allocation4], 0  ;;  %s1323_s0 = inlined_call_operand.vmem [shape: f32[2], index: 0, kind: input, shape index: {}]   ;;  %s1324_s1 = inlined_call_operand.vmem [shape: f32[2,4,256], index: 1, kind: input, shape index: {}]   ;;  %s1325_s2 = inlined_call_operand.vmem [shape: f32[2,4,256], index: 2, kind: input, shape index: {}]   ;;  %s1326_s3 = inlined_call_operand.vmem [shape: f32[32,42], index: 3, kind: input, shape index: {}]   ;;  %s1327_s4 = inlined_call_operand.vmem [shape: f32[4,33], index: 4, kind: input, shape index: {}]   ;;  %s1328_s5 = inlined_call_operand.hbm [shape: f32[1,1], index: 5, kind: output, shape index: {}]  }
   0x1   :  { %11 = vsyncpa [#allocation3], 0  ;;  %s18_s20 = sshll.u32 %s1323_s0, 4  ;;  %s19_s20 = int_to_ptr.vmem [resolvable:$true] %s18_s20 }
   0x2   :  { %s975_s21 = scalar_lea.vmem %s19_s20, 16  ;;  %p980_p1 = scmp.lt.s32.totalorder %s19_s20, %s19_s20 }
   0x3   :  { %p976_p0 = scmp.ne.s32.totalorder %s19_s20, %s975_s21  ;;  %p981_p2 = scmp.lt.s32.totalorder %s975_s21, %s975_s21 }
   0x5   :  { %p982_p3 = por %p981_p2, %p980_p1 }
   0x7   :  { %p983_p4 = pnand %p982_p3, %p976_p0 }
   0x9   :  { %986 = shalt.err (!%p983_p4)
}
   0xa   :  { %s999_s22 = smov [#allocation2]  }
   0xb   :  { %21 = dma.vmem_to_smem %s19_s20, 16, %s999_s22, [#allocation4]  }
   0xc   :  { %995 = dma.done.wait [#allocation4], 16  }
   0xd   :  { %996 = vsyncadd [#allocation4], 4294967280 }
   0xe   :  { %33 = sfence }
   0xf   :  { %s1038_s23 = sld [smem:[#allocation2]]  ;;  %v37_v0 = vld [vmem:[%s1326_s3 + $0x10] sm:$0xff]  ;;  %v38_v1 = vld [vmem:[%s1326_s3 + $0x18] sm:$0xff]  ;;  %v1000_v2 = vmov 0   ;;  %v1053_v3 = vld [vmem:[%s1327_s4] sm:$0xf]  ;;  %v128_v34 = vlaneseq }
  0x10   :  { %s1040_s24 = sld [smem:[#allocation2 + $0x1]]  ;;  %228 = vmatprep.mubr.bf16.mxu0 %v1000_v2  ;;  %281 = vmatprep.mubr.bf16.mxu1 %v1000_v2  ;;  %v1055_v4 = vpack.c.bf16 %v38_v1, %v37_v0  ;;  %v35_v6 = vld [vmem:[%s1326_s3] sm:$0xff]  ;;  %v36_v7 = vld [vmem:[%s1326_s3 + $0x8] sm:$0xff]  ;;  %v1001_v8 = vmov 32   ;;  %s1002_s4 = smov 122   ;;  %vm162_vm8 = vcmask 1043456  }
  0x11   :  { %954 = vset.pattern.permute.xlu0 %v1001_v8  ;;  %v1071_v13 = vpack.c.bf16 %v36_v7, %v35_v6  ;;  %v43_v32 = vld [vmem:[%s1324_s1] sm:$0xff]  ;;  %v909_v35 = vld [vmem:[%s1324_s1 + $0x8] sm:$0xff]  ;;  %v129_v38 = vshrl.u32 %v128_v34, 7  ;;  %vm167_vm9 = vcmask 1044480   ;;  %vm183_vm10 = vcmask 1042432   ;;  %s1004_s20 = smov [#allocation5]  }
  0x12   :  { %328 = vperm.xlu0 %954, %v1053_v3   ;;  %441 = vrot.lane.b32.xlu1 %v1055_v4, %s1002_s4  ;;  %v47_v36 = vcombine.high %v43_v32, %v43_v32  ;;  %v50_v37 = vcombine.high %v909_v35, %v909_v35  ;;  %v120_v39 = vmul.f32 2.0, %v43_v32  ;;  %v122_v41 = vmul.f32 2.0, %v909_v35  ;;  %v1091_v55 = vld [vmem:[%s1325_s2] sm:$0xff]  ;;  %v1098_v61 = vld [vmem:[%s1325_s2 + $0x8] sm:$0xff]  ;;  %s1003_s2 = smov 90  }
  0x13   :  { %v130_v43 = vsub.s32 0, %v129_v38  ;;  %v1108_v7 = vcombine.high %v1091_v55, %v1091_v55  ;;  %vm176_vm11 = vcmask 48128   ;;  %vm331_vm12 = vcmask 261120  }
  0x14   :  { %v121_v40 = vmul.f32 2.0, %v47_v36  ;;  %v123_v42 = vmul.f32 2.0, %v50_v37  ;;  %v1080_v44 = vadd.f32 -1.0, %v120_v39  ;;  %v1084_v48 = vadd.f32 -1.0, %v122_v41 }
  0x15   :  { %v62_v5 = vstv %s1038_s23  ;;  %1339 = vst [vmem:[#allocation11_spill] sm:$0xff] %v1108_v7  ;;  %vm586_vm13 = vcmask 1041408   ;;  %vm579_vm14 = vcmask 31744   ;;  %vm874_vm15 = vcmask 1040384  }
  0x16   :  { %v65_v9 = vmul.f32 6.0, %v62_v5  ;;  %v64_v10 = vstv %s1040_s24  ;;  %439 = vrot.lane.b32.xlu0 %v1071_v13, %s1002_s4  ;;  %v1082_v47 = vadd.f32 -1.0, %v121_v40  ;;  %1337 = vst [vmem:[#allocation9_spill] sm:$0xff] %v1084_v48  ;;  %v1086_v53 = vadd.f32 -1.0, %v123_v42  ;;  %575 = vrot.lane.b32.xlu1 %v1071_v13, %s1003_s2 }
  0x17   :  { %v66_v11 = vmul.f32 6.0, %v64_v10 }
  0x18   :  { %v912_v12 = vadd.f32 -3.0, %v65_v9  ;;  %1336 = vst [vmem:[#allocation8_spill] sm:$0xff] %v1082_v47  ;;  %1338 = vst [vmem:[#allocation10_spill] sm:$0xff] %v1086_v53 }
  0x19   :  { %v913_v14 = vadd.f32 -3.0, %v66_v11 }
  0x1a   :  { %v914_v15 = vmul.f32 -1.442695, %v912_v12  ;;  %v1119_v12 = vcombine.high %v1098_v61, %v1098_v61  ;;  %577 = vrot.lane.b32.xlu0 %v1055_v4, %s1003_s2 }
  0x1b   :  { %v915_v16 = vmul.f32 -1.442695, %v913_v14 }
  0x1c   :  { %959 = vpow2.f32 %v914_v15  ;;  %1340 = vst [vmem:[#allocation12_spill] sm:$0xff] %v1119_v12 }
  0x1d   :  { %961 = vpow2.f32 %v915_v16 }
  0x29   :  { %v960_v17 = vpop.eup %959 }
  0x2a   :  { %v962_v18 = vpop.eup %961  ;;  %v75_v19 = vadd.f32 1.0, %v960_v17 }
  0x2b   :  { %v76_v20 = vadd.f32 1.0, %v962_v18 }
  0x2c   :  { %963 = vrcp.f32 %v75_v19 }
  0x2d   :  { %965 = vrcp.f32 %v76_v20 }
  0x39   :  { %v964_v21 = vpop.eup %963 }
  0x3a   :  { %v966_v22 = vpop.eup %965  ;;  %v81_v23 = vsub.f32 0.95257413, %v964_v21 }
  0x3b   :  { %v82_v24 = vsub.f32 0.95257413, %v966_v22 }
  0x3c   :  { %v84_v25 = vmul.f32 1.1047914, %v81_v23 }
  0x3d   :  { %v85_v26 = vmul.f32 1.1047914, %v82_v24  ;;  %v158_v24 = vrot.slane %v62_v5, 3 }
  0x3e   :  { %v86_v27 = vmax.f32 %v84_v25, 1e-09 }
  0x3f   :  { %v87_v28 = vmax.f32 %v85_v26, 1e-09 }
  0x40   :  { %v88_v29 = vmin.f32 %v86_v27, 1.0 }
  0x41   :  { %v89_v30 = vmin.f32 %v87_v28, 1.0  ;;  %v159_v28 = vrot.slane %v64_v10, 3 }
  0x42   :  { %967 = vrsqrt.f32 %v88_v29  ;;  %v104_v31 = vsub.f32 1.0, %v88_v29  ;;  %vm92_vm0 = vcmp.eq.f32.partialorder %v88_v29, inf  ;;  %v95_v46 = vand.u32 2147483648, %v88_v29 }
  0x43   :  { %969 = vrsqrt.f32 %v89_v30  ;;  %v105_v33 = vsub.f32 1.0, %v89_v30  ;;  %vm94_vm1 = vcmp.eq.f32.partialorder %v88_v29, 0.0  ;;  %vm99_vm2 = vcmp.eq.f32.partialorder %v89_v30, inf }
  0x44   :  { %971 = vrsqrt.f32 %v104_v31  ;;  %v102_v51 = vand.u32 2147483648, %v89_v30  ;;  %vm108_vm3 = vcmp.eq.f32.partialorder %v104_v31, inf  ;;  %vm101_vm4 = vcmp.eq.f32.partialorder %v89_v30, 0.0 }
  0x45   :  { %973 = vrsqrt.f32 %v105_v33  ;;  %vm110_vm5 = vcmp.eq.f32.partialorder %v104_v31, 0.0  ;;  %v111_v57 = vand.u32 2147483648, %v104_v31  ;;  %vm115_vm6 = vcmp.eq.f32.partialorder %v105_v33, inf }
  0x46   :  { %v118_v63 = vand.u32 2147483648, %v105_v33  ;;  %vm117_vm7 = vcmp.eq.f32.partialorder %v105_v33, 0.0 }
  0x4f   :  { %v968_v45 = vpop.eup %967 }
  0x50   :  { %v970_v49 = vpop.eup %969  ;;  %v91_v50 = vmul.f32 %v968_v45, %v88_v29 }
  0x51   :  { %v98_v52 = vmul.f32 %v970_v49, %v89_v30  ;;  %v972_v54 = vpop.eup %971 }
  0x52   :  { %v93_v56 = vsel %vm92_vm0, %v88_v29, %v91_v50  ;;  %v974_v58 = vpop.eup %973  ;;  %v107_v60 = vmul.f32 %v972_v54, %v104_v31 }
  0x53   :  { %v1093_v59 = vsel %vm94_vm1, %v95_v46, %v93_v56  ;;  %v100_v62 = vsel %vm99_vm2, %v89_v30, %v98_v52  ;;  %v114_v6 = vmul.f32 %v974_v58, %v105_v33 }
  0x54   :  { %v1102_v0 = vrot.slane %v1093_v59, %v130_v43  ;;  %v1104_v1 = vsel %vm101_vm4, %v102_v51, %v100_v62  ;;  %v109_v8 = vsel %vm108_vm3, %v104_v31, %v107_v60 }
  0x55   :  { %v1112_v9 = vrot.slane %v1104_v1, %v130_v43  ;;  %v1115_v11 = vsel %vm110_vm5, %v111_v57, %v109_v8  ;;  %v116_v14 = vsel %vm115_vm6, %v105_v33, %v114_v6 }
  0x56   :  { %v137_v15 = vmul.f32 %v1082_v47, %v1102_v0  ;;  %v1125_v16 = vrot.slane %v1115_v11, %v130_v43  ;;  %v1127_v17 = vsel %vm117_vm7, %v118_v63, %v116_v14  ;;  %v136_v18 = vmul.f32 %v1080_v44, %v1102_v0 }
  0x57   :  { %v139_v19 = vmul.f32 %v1086_v53, %v1112_v9  ;;  %v1134_v20 = vrot.slane %v1127_v17, %v130_v43  ;;  %v138_v21 = vmul.f32 %v1084_v48, %v1112_v9 }
  0x58   :  { %v149_v22 = vmul.f32 %v1125_v16, %v1108_v7  ;;  %v148_v23 = vmul.f32 %v1125_v16, %v1091_v55 }
  0x59   :  { %v151_v25 = vmul.f32 %v1134_v20, %v1119_v12  ;;  %v150_v26 = vmul.f32 %v1098_v61, %v1134_v20 }
  0x5a   :  { %v1148_v27 = vadd.f32 %v149_v22, %v137_v15  ;;  %v1152_v29 = vadd.f32 %v148_v23, %v136_v18 }
  0x5b   :  { %v1154_v30 = vadd.f32 %v151_v25, %v139_v19  ;;  %v1156_v31 = vadd.f32 %v150_v26, %v138_v21 }
  0x5c   :  { %v164_v5 = vsel %vm162_vm8, %v1148_v27, 1.0  ;;  %v163_v32 = vsel %vm162_vm8, %v1152_v29, 1.0 }
  0x5d   :  { %v169_v33 = vsel %vm167_vm9, %v164_v5, %v158_v24  ;;  %v166_v34 = vsel %vm162_vm8, %v1154_v30, 1.0  ;;  %v168_v35 = vsel %vm167_vm9, %v163_v32, %v158_v24  ;;  %v165_v10 = vsel %vm162_vm8, %v1156_v31, 1.0 }
  0x5e   :  { %v173_v36 = vpack.c.bf16 %v169_v33, %v169_v33  ;;  %v171_v37 = vsel %vm167_vm9, %v166_v34, %v159_v28  ;;  %v172_v38 = vpack.c.bf16 %v168_v35, %v168_v35  ;;  %v170_v39 = vsel %vm167_vm9, %v165_v10, %v159_v28 }
  0x5f   :  { %v175_v40 = vpack.c.bf16 %v171_v37, %v171_v37  ;;  %v174_v41 = vpack.c.bf16 %v170_v39, %v170_v39 }
  0x60   :  { %920 = vmatprep.subr.msk.bf16.mxu0 %vm183_vm10, %v173_v36  ;;  %v185_v42 = vsel %vm183_vm10, %v172_v38, 0 }
  0x61   :  { %923 = vmatprep.subr.msk.bf16.mxu1 %vm183_vm10, %v175_v40  ;;  %211 = vmatpush1.bf16.msra.mxu0 %v185_v42  ;;  %v191_v43 = vsel %vm183_vm10, %v174_v41, 0  ;;  %v1230_v41 = vpack.c.bf16 %v1053_v3, %v1053_v3 }
  0x62   :  { %264 = vmatpush1.bf16.msra.mxu1 %v191_v43 }
  0x64   :  { %921 = vmatmul.mubr.msk.bf16.vlgmr.msra.gmra.mxu0 %vm176_vm11, %v1071_v13 }
  0x65   :  { %924 = vmatmul.mubr.msk.bf16.vlgmr.msra.gmra.mxu1 %vm176_vm11, %v1071_v13  ;;  %238 = vmatprep.mubr.bf16.mxu0 %v1000_v2 }
  0x66   :  { %291 = vmatprep.mubr.bf16.mxu1 %v1000_v2 }
  0x6c   :  { %922 = vmatmul.mubr.msk.bf16.gmra.mxu0 %vm176_vm11, %v1055_v4 }
  0x6d   :  { %925 = vmatmul.mubr.msk.bf16.gmra.mxu1 %vm176_vm11, %v1055_v4  ;;  %367 = vmatprep.mubr.bf16.mxu0 %v1000_v2 }
  0x6e   :  { %408 = vmatprep.mubr.bf16.mxu1 %v1000_v2 }
  0x8d   :  { %v1232_v43 = vpop.permute.xlu0 %328 }
  0x8e   :  { %1341 = vst [vmem:[#allocation13_spill] sm:$0xff] %v1232_v43 }
  0x91   :  { %v440_v3 = vpop.permute.xlu0 %439 }
 0x124   :  { %v1180_v45 = vpop.f32.mrf.mxu0 }
 0x125   :  { %v1182_v46 = vpop.f32.mrf.mxu1  ;;  %v302_v38 = vmax.f32 %v1180_v45, 0.0 }
 0x126   :  { %v1184_v49 = vpop.f32.mrf.mxu0  ;;  %v304_v35 = vmax.f32 %v1182_v46, 0.0 }
 0x127   :  { %v1186_v50 = vpop.f32.mrf.mxu1  ;;  %v303_v26 = vmax.f32 %v1184_v49, 0.0 }
 0x128   :  { %v1188_v51 = vpop.f32.mrf.mxu0  ;;  %v305_v5 = vmax.f32 %v1186_v50, 0.0 }
 0x129   :  { %v1190_v52 = vpop.f32.mrf.mxu1  ;;  %v306_v32 = vmax.f32 %v1188_v51, 0.0 }
 0x12a   :  { %v1192_v54 = vpop.f32.mrf.mxu0  ;;  %v308_v10 = vmax.f32 %v1190_v52, 0.0 }
 0x12b   :  { %v1194_v56 = vpop.f32.mrf.mxu1  ;;  %v307_v63 = vmax.f32 %v1192_v54, 0.0  ;;  %v318_v40 = vpack.c.bf16 %v306_v32, %v302_v38 }
 0x12c   :  { %v1196_v57 = vpop.f32.mrf.mxu0  ;;  %v309_v22 = vmax.f32 %v1194_v56, 0.0  ;;  %v320_v42 = vpack.c.bf16 %v308_v10, %v304_v35 }
 0x12d   :  { %v1198_v13 = vpop.f32.mrf.mxu1  ;;  %v310_v23 = vmax.f32 %v1196_v57, 0.0  ;;  %v319_v36 = vpack.c.bf16 %v307_v63, %v303_v26  ;;  %v442_v63 = vpop.permute.xlu1 %441  ;;  %v418_v26 = vmul.f32 %v1148_v27, %v1102_v0 }
 0x12e   :  { %v1200_v4 = vpop.f32.mrf.mxu0  ;;  %v312_v14 = vmax.f32 %v1198_v13, 0.0  ;;  %v321_v39 = vpack.c.bf16 %v309_v22, %v305_v5  ;;  %v419_v22 = vmul.f32 %v1156_v31, %v1112_v9 }
 0x12f   :  { %v1202_v58 = vpop.f32.mrf.mxu1  ;;  %v311_v15 = vmax.f32 %v1200_v4, 0.0 }
 0x130   :  { %v1204_v60 = vpop.f32.mrf.mxu0  ;;  %v313_v24 = vmax.f32 %v1202_v58, 0.0 }
 0x131   :  { %v1206_v62 = vpop.f32.mrf.mxu1  ;;  %v314_v6 = vmax.f32 %v1204_v60, 0.0 }
 0x132   :  { %v1210_v8 = vpop.f32.mrf.mxu0  ;;  %v316_v18 = vmax.f32 %v1206_v62, 0.0 }
 0x133   :  { %v315_v19 = vmax.f32 %v1210_v8, 0.0  ;;  %v1216_v21 = vpop.f32.mrf.mxu1  ;;  %v322_v33 = vpack.c.bf16 %v314_v6, %v310_v23 }
 0x134   :  { %v317_v25 = vmax.f32 %v1216_v21, 0.0  ;;  %v324_v37 = vpack.c.bf16 %v316_v18, %v312_v14 }
 0x135   :  { %v323_v28 = vpack.c.bf16 %v315_v19, %v311_v15  ;;  %v417_v15 = vmul.f32 %v1152_v29, %v1102_v0  ;;  %v420_v29 = vmul.f32 %v1154_v30, %v1112_v9 }
 0x136   :  { %v325_v34 = vpack.c.bf16 %v317_v25, %v313_v24 }
 0x137   :  { %347 = vmatprep.subr.bf16.mxu0 %v323_v28 }
 0x138   :  { %388 = vmatprep.subr.bf16.mxu1 %v325_v34  ;;  %348 = vmatpush1.bf16.msra.mxu0 %v322_v33 }
 0x139   :  { %389 = vmatpush1.bf16.msra.mxu1 %v324_v37  ;;  %349 = vmatprep.subr.bf16.mxu0 %v319_v36 }
 0x13a   :  { %390 = vmatprep.subr.bf16.mxu1 %v321_v39 }
 0x13c   :  { %350 = vmatpush1.bf16.msra.mxu0 %v318_v40 }
 0x13d   :  { %391 = vmatpush1.bf16.msra.mxu1 %v320_v42  ;;  %461 = vmatprep.subr.bf16.mxu0 %v323_v28 }
 0x13e   :  { %514 = vmatprep.subr.bf16.mxu1 %v325_v34 }
 0x13f   :  { %926 = vmatmul.mubr.msk.bf16.vlgmr.msra.gmra.mxu0 %vm331_vm12, %v1230_v41 }
 0x140   :  { %927 = vmatmul.mubr.msk.bf16.vlgmr.msra.gmra.mxu1 %vm331_vm12, %v1230_v41  ;;  %462 = vmatpush1.bf16.msra.mxu0 %v322_v33 }
 0x141   :  { %515 = vmatpush1.bf16.msra.mxu1 %v324_v37  ;;  %463 = vmatprep.subr.bf16.mxu0 %v319_v36 }
 0x142   :  { %516 = vmatprep.subr.bf16.mxu1 %v321_v39  ;;  %481 = vmatprep.mubr.bf16.mxu0 %v1000_v2 }
 0x143   :  { %534 = vmatprep.mubr.bf16.mxu1 %v1000_v2 }
 0x144   :  { %464 = vmatpush1.bf16.msra.mxu0 %v318_v40 }
 0x145   :  { %517 = vmatpush1.bf16.msra.mxu1 %v320_v42 }
 0x147   :  { %932 = vmatmul.mubr.msk.bf16.vlgmr.msra.gmra.mxu0 %vm331_vm12, %v440_v3 }
 0x148   :  { %934 = vmatmul.mubr.msk.bf16.vlgmr.msra.gmra.mxu1 %vm331_vm12, %v440_v3  ;;  %491 = vmatprep.mubr.bf16.mxu0 %v1000_v2 }
 0x149   :  { %544 = vmatprep.mubr.bf16.mxu1 %v1000_v2 }
 0x14f   :  { %933 = vmatmul.mubr.msk.bf16.gmra.mxu0 %vm331_vm12, %v442_v63 }
 0x150   :  { %935 = vmatmul.mubr.msk.bf16.gmra.mxu1 %vm331_vm12, %v442_v63  ;;  %631 = vmatprep.mubr.bf16.mxu0 %v1000_v2 }
 0x151   :  { %684 = vmatprep.mubr.bf16.mxu1 %v1000_v2 }
 0x1ff   :  { %v369_v6 = vpop.f32.mrf.mxu0 }
 0x200   :  { %v370_v14 = vadd.f32 %v369_v6, %v1232_v43  ;;  %v410_v18 = vpop.f32.mrf.mxu1 }
 0x201   :  { %v411_v19 = vadd.f32 %v410_v18, %v1232_v43  ;;  %v371_v23 = vpop.f32.mrf.mxu0 }
 0x202   :  { %v421_v24 = vmul.f32 %v370_v14, %v1125_v16  ;;  %v372_v25 = vadd.f32 %v371_v23, %v1232_v43  ;;  %v412_v28 = vpop.f32.mrf.mxu1  ;;  %v578_v23 = vpop.permute.xlu0 %577 }
 0x203   :  { %v423_v5 = vmul.f32 %v411_v19, %v1134_v20  ;;  %v413_v32 = vadd.f32 %v412_v28, %v1232_v43  ;;  %v373_v33 = vpop.f32.mrf.mxu0 }
 0x204   :  { %v425_v34 = vsub.f32 %v417_v15, %v421_v24  ;;  %v422_v31 = vmul.f32 %v372_v25, %v1125_v16  ;;  %v414_v35 = vpop.f32.mrf.mxu1 }
 0x205   :  { %v427_v10 = vsub.f32 %v419_v22, %v423_v5  ;;  %v424_v36 = vmul.f32 %v413_v32, %v1134_v20  ;;  %v374_v37 = vpop.f32.mrf.mxu0  ;;  %v576_v22 = vpop.permute.xlu1 %575 }
 0x206   :  { %v928_v38 = vclamps-f32 %v425_v34, 1.0  ;;  %v426_v39 = vsub.f32 %v418_v26, %v422_v31  ;;  %v415_v27 = vpop.f32.mrf.mxu1 }
 0x207   :  { %v930_v40 = vclamps-f32 %v427_v10, 1.0  ;;  %v428_v42 = vsub.f32 %v420_v29, %v424_v36  ;;  %v483_v24 = vpop.f32.mrf.mxu0 }
 0x208   :  { %v929_v3 = vclamps-f32 %v426_v39, 1.0  ;;  %v571_v63 = vpack.c.bf16 %v928_v38, %v928_v38  ;;  %v536_v25 = vpop.f32.mrf.mxu1 }
 0x209   :  { %v931_v6 = vclamps-f32 %v428_v42, 1.0  ;;  %v573_v14 = vpack.c.bf16 %v930_v40, %v930_v40  ;;  %v485_v26 = vpop.f32.mrf.mxu0 }
 0x20a   :  { %v572_v30 = vpack.c.bf16 %v929_v3, %v929_v3  ;;  %v588_v15 = vsel %vm586_vm13, %v571_v63, 0  ;;  %v538_v28 = vpop.f32.mrf.mxu1 }
 0x20b   :  { %v574_v18 = vpack.c.bf16 %v931_v6, %v931_v6  ;;  %v594_v19 = vsel %vm586_vm13, %v573_v14, 0  ;;  %v487_v5 = vpop.f32.mrf.mxu0 }
 0x20c   :  { %936 = vmatprep.subr.msk.bf16.mxu0 %vm586_vm13, %v572_v30  ;;  %v540_v32 = vpop.f32.mrf.mxu1  ;;  %v559_v43 = vadd.f32 %v487_v5, %v1188_v51 }
 0x20d   :  { %939 = vmatprep.subr.msk.bf16.mxu1 %vm586_vm13, %v574_v18  ;;  %614 = vmatpush1.bf16.msra.mxu0 %v588_v15  ;;  %v489_v29 = vpop.f32.mrf.mxu0  ;;  %v555_v18 = vadd.f32 %v483_v24, %v1180_v45  ;;  %v557_v15 = vadd.f32 %v536_v25, %v1182_v46  ;;  %v561_v53 = vadd.f32 %v540_v32, %v1190_v52 }
 0x20e   :  { %667 = vmatpush1.bf16.msra.mxu1 %v594_v19  ;;  %v542_v33 = vpop.f32.mrf.mxu1  ;;  %v556_v19 = vadd.f32 %v485_v26, %v1184_v49  ;;  %v560_v12 = vadd.f32 %v489_v29, %v1192_v54 }
 0x20f   :  { %v493_v34 = vpop.f32.mrf.mxu0  ;;  %v562_v47 = vadd.f32 %v542_v33, %v1194_v56 }
 0x210   :  { %937 = vmatmul.mubr.msk.bf16.vlgmr.msra.gmra.mxu0 %vm579_vm14, %v576_v22  ;;  %v546_v31 = vpop.f32.mrf.mxu1  ;;  %v563_v48 = vadd.f32 %v493_v34, %v1196_v57 }
 0x211   :  { %940 = vmatmul.mubr.msk.bf16.vlgmr.msra.gmra.mxu1 %vm579_vm14, %v576_v22  ;;  %641 = vmatprep.mubr.bf16.mxu0 %v1000_v2  ;;  %v495_v35 = vpop.f32.mrf.mxu0  ;;  %v558_v22 = vadd.f32 %v538_v28, %v1186_v50  ;;  %v565_v45 = vadd.f32 %v546_v31, %v1198_v13 }
 0x212   :  { %694 = vmatprep.mubr.bf16.mxu1 %v1000_v2  ;;  %v548_v10 = vpop.f32.mrf.mxu1  ;;  %v564_v46 = vadd.f32 %v495_v35, %v1200_v4 }
 0x213   :  { %v497_v36 = vpop.f32.mrf.mxu0  ;;  %v566_v50 = vadd.f32 %v548_v10, %v1202_v58 }
 0x214   :  { %v550_v37 = vpop.f32.mrf.mxu1  ;;  %v567_v49 = vadd.f32 %v497_v36, %v1204_v60 }
 0x215   :  { %v499_v38 = vpop.f32.mrf.mxu0  ;;  %v569_v51 = vadd.f32 %v550_v37, %v1206_v62 }
 0x216   :  { %v552_v39 = vpop.f32.mrf.mxu1  ;;  %v568_v52 = vadd.f32 %v499_v38, %v1210_v8 }
 0x217   :  { %v570_v54 = vadd.f32 %v552_v39, %v1216_v21 }
 0x218   :  { %938 = vmatmul.mubr.msk.bf16.gmra.mxu0 %vm579_vm14, %v578_v23 }
 0x219   :  { %941 = vmatmul.mubr.msk.bf16.gmra.mxu1 %vm579_vm14, %v578_v23  ;;  %777 = vmatprep.mubr.bf16.mxu0 %v1000_v2 }
 0x21a   :  { %818 = vmatprep.mubr.bf16.mxu1 %v1000_v2 }
 0x2d0   :  { %v633_v27 = vpop.f32.mrf.mxu0 }
 0x2d1   :  { %v686_v40 = vpop.f32.mrf.mxu1  ;;  %v705_v56 = vadd.f32 %v633_v27, %v555_v18 }
 0x2d2   :  { %v635_v42 = vpop.f32.mrf.mxu0  ;;  %v707_v27 = vadd.f32 %v686_v40, %v557_v15  ;;  %v868_v15 = vmul.f32 5.0, %v1115_v11 }
 0x2d3   :  { %v688_v2 = vpop.f32.mrf.mxu1  ;;  %v706_v33 = vadd.f32 %v635_v42, %v556_v19 }
 0x2d4   :  { %v637_v3 = vpop.f32.mrf.mxu0  ;;  %v708_v34 = vadd.f32 %v688_v2, %v558_v22 }
 0x2d5   :  { %v690_v63 = vpop.f32.mrf.mxu1  ;;  %v709_v35 = vadd.f32 %v637_v3, %v559_v43 }
 0x2d6   :  { %v639_v6 = vpop.f32.mrf.mxu0  ;;  %v711_v8 = vadd.f32 %v690_v63, %v561_v53  ;;  %v724_v2 = vmax.f32 %v708_v34, 0.0  ;;  %v721_v63 = vmax.f32 %v705_v56, 0.0 }
 0x2d7   :  { %v692_v14 = vpop.f32.mrf.mxu1  ;;  %v710_v26 = vadd.f32 %v639_v6, %v560_v12  ;;  %v722_v6 = vmax.f32 %v706_v33, 0.0 }
 0x2d8   :  { %v643_v30 = vpop.f32.mrf.mxu0  ;;  %v712_v13 = vadd.f32 %v692_v14, %v562_v47  ;;  %v727_v43 = vmax.f32 %v711_v8, 0.0 }
 0x2d9   :  { %v696_v23 = vpop.f32.mrf.mxu1  ;;  %v713_v32 = vadd.f32 %v643_v30, %v563_v48  ;;  %v726_v36 = vmax.f32 %v710_v26, 0.0  ;;  %v725_v30 = vmax.f32 %v709_v35, 0.0 }
 0x2da   :  { %v645_v7 = vpop.f32.mrf.mxu0  ;;  %v715_v58 = vadd.f32 %v696_v23, %v565_v45  ;;  %v728_v38 = vmax.f32 %v712_v13, 0.0  ;;  %v723_v23 = vmax.f32 %v707_v27, 0.0 }
 0x2db   :  { %v698_v24 = vpop.f32.mrf.mxu1  ;;  %v714_v28 = vadd.f32 %v645_v7, %v564_v46  ;;  %v729_v39 = vmax.f32 %v713_v32, 0.0  ;;  %v738_v53 = vpack.c.bf16 %v726_v36, %v722_v6  ;;  %v737_v45 = vpack.c.bf16 %v725_v30, %v721_v63  ;;  %v1344_v32 = vld [vmem:[#allocation8_spill] sm:$0xff] }
 0x2dc   :  { %v647_v25 = vpop.f32.mrf.mxu0  ;;  %v716_v4 = vadd.f32 %v698_v24, %v566_v50  ;;  %v731_v14 = vmax.f32 %v715_v58, 0.0  ;;  %v740_v22 = vpack.c.bf16 %v728_v38, %v724_v2  ;;  %v739_v40 = vpack.c.bf16 %v727_v43, %v723_v23 }
 0x2dd   :  { %v717_v57 = vadd.f32 %v647_v25, %v567_v49  ;;  %v700_v5 = vpop.f32.mrf.mxu1  ;;  %v730_v37 = vmax.f32 %v714_v28, 0.0  ;;  %v866_v46 = vmul.f32 %v1093_v59, %v1093_v59  ;;  %v869_v49 = vmul.f32 5.0, %v1127_v17 }
 0x2de   :  { %v719_v29 = vadd.f32 %v700_v5, %v569_v51  ;;  %v649_v60 = vpop.f32.mrf.mxu0  ;;  %v732_v47 = vmax.f32 %v716_v4, 0.0  ;;  %v870_v24 = vmul.f32 %v868_v15, %v1115_v11  ;;  %v867_v50 = vmul.f32 %v1104_v1, %v1104_v1  ;;  %v1343_v5 = vld [vmem:[#allocation11_spill] sm:$0xff] }
 0x2df   :  { %v718_v31 = vadd.f32 %v649_v60, %v568_v52  ;;  %v702_v62 = vpop.f32.mrf.mxu1  ;;  %v733_v10 = vmax.f32 %v717_v57, 0.0  ;;  %v871_v51 = vmul.f32 %v869_v49, %v1127_v17  ;;  %v827_v59 = vmul.f32 %v1102_v0, %v1091_v55  ;;  %v1342_v17 = vld [vmem:[#allocation9_spill] sm:$0xff]  ;;  %v1346_v55 = vld [vmem:[#allocation10_spill] sm:$0xff] }
 0x2e0   :  { %v720_v21 = vadd.f32 %v702_v62, %v570_v54  ;;  %v735_v12 = vmax.f32 %v719_v29, 0.0  ;;  %v872_v52 = vmin.f32 %v866_v46, %v870_v24  ;;  %v831_v11 = vmul.f32 %v1080_v44, %v1125_v16  ;;  %v1345_v29 = vld [vmem:[#allocation12_spill] sm:$0xff] }
 0x2e1   :  { %v734_v7 = vmax.f32 %v718_v31, 0.0  ;;  %v741_v18 = vpack.c.bf16 %v733_v10, %v729_v39  ;;  %v873_v54 = vmin.f32 %v867_v50, %v871_v51  ;;  %v829_v1 = vmul.f32 %v1098_v61, %v1112_v9  ;;  %v1347_v31 = vld [vmem:[#allocation13_spill] sm:$0xff] }
 0x2e2   :  { %v736_v48 = vmax.f32 %v720_v21, 0.0  ;;  %v743_v3 = vpack.c.bf16 %v735_v12, %v731_v14  ;;  %v875_v25 = vsel %vm874_vm15, %v872_v52, 0.0  ;;  %v833_v57 = vmul.f32 %v1342_v17, %v1134_v20 }
 0x2e3   :  { %v742_v42 = vpack.c.bf16 %v734_v7, %v730_v37  ;;  %v876_v56 = vadd.f32 %v875_v25, %v875_v25  ;;  %v828_v13 = vmul.f32 %v1102_v0, %v1343_v5  ;;  %v832_v4 = vmul.f32 %v1344_v32, %v1125_v16 }
 0x2e4   :  { %v744_v19 = vpack.c.bf16 %v736_v48, %v732_v47  ;;  %v830_v60 = vmul.f32 %v1112_v9, %v1345_v29  ;;  %v834_v33 = vmul.f32 %v1346_v55, %v1134_v20  ;;  %v835_v34 = vsub.f32 %v827_v59, %v831_v11 }
 0x2e5   :  { %757 = vmatprep.subr.bf16.mxu0 %v742_v42  ;;  %v837_v58 = vsub.f32 %v829_v1, %v833_v57  ;;  %v836_v35 = vsub.f32 %v828_v13, %v832_v4 }
 0x2e6   :  { %798 = vmatprep.subr.bf16.mxu1 %v744_v19  ;;  %758 = vmatpush1.bf16.msra.mxu0 %v741_v18  ;;  %v838_v0 = vsub.f32 %v830_v60, %v834_v33 }
 0x2e7   :  { %799 = vmatpush1.bf16.msra.mxu1 %v743_v3  ;;  %759 = vmatprep.subr.bf16.mxu0 %v738_v53 }
 0x2e8   :  { %800 = vmatprep.subr.bf16.mxu1 %v740_v22 }
 0x2ea   :  { %760 = vmatpush1.bf16.msra.mxu0 %v737_v45 }
 0x2eb   :  { %801 = vmatpush1.bf16.msra.mxu1 %v739_v40 }
 0x2ed   :  { %942 = vmatmul.mubr.msk.bf16.vlgmr.msra.gmra.mxu0 %vm331_vm12, %v1230_v41 }
 0x2ee   :  { %943 = vmatmul.mubr.msk.bf16.vlgmr.msra.gmra.mxu1 %vm331_vm12, %v1230_v41  ;;  %v877_v41 = vsel %vm874_vm15, %v873_v54, 0.0 }
 0x2ef   :  { %v878_v26 = vadd.f32 %v877_v41, %v876_v56 }
 0x2f1   :  { %v879_v28 = vadd.f32 %v878_v26, %v877_v41 }
 0x2f3   :  { %880 = vadd.xlane.f32.xlu0 %v879_v28 }
 0x37c   :  { %v881_v3 = vpop.xlane.xlu0 %880 }
 0x37d   :  { %v882_v63 = vrot.slane %v881_v3, 4 }
 0x37f   :  { %v883_v22 = vadd.f32 %v882_v63, %v881_v3 }
 0x381   :  { %v884_v23 = vrot.slane %v883_v22, 2 }
 0x383   :  { %v885_v46 = vadd.f32 %v884_v23, %v883_v22 }
 0x385   :  { %v886_v50 = vrot.slane %v885_v46, 1 }
 0x387   :  { %v887_v54 = vadd.f32 %v886_v50, %v885_v46 }
 0x3ad   :  { %v779_v44 = vpop.f32.mrf.mxu0 }
 0x3ae   :  { %v780_v61 = vadd.f32 %v779_v44, %v1347_v31  ;;  %v820_v62 = vpop.f32.mrf.mxu1 }
 0x3af   :  { %v821_v8 = vadd.f32 %v820_v62, %v1347_v31  ;;  %v781_v10 = vpop.f32.mrf.mxu0 }
 0x3b0   :  { %v839_v21 = vsub.f32 %v780_v61, %v835_v34  ;;  %v782_v16 = vadd.f32 %v781_v10, %v1347_v31  ;;  %v822_v36 = vpop.f32.mrf.mxu1 }
 0x3b1   :  { %v841_v37 = vsub.f32 %v821_v8, %v837_v58  ;;  %v823_v9 = vadd.f32 %v822_v36, %v1347_v31  ;;  %v783_v12 = vpop.f32.mrf.mxu0 }
 0x3b2   :  { %v843_v20 = vmul.f32 %v839_v21, %v839_v21  ;;  %v840_v7 = vsub.f32 %v782_v16, %v836_v35  ;;  %v824_v38 = vpop.f32.mrf.mxu1 }
 0x3b3   :  { %v842_v39 = vsub.f32 %v823_v9, %v838_v0  ;;  %v784_v47 = vpop.f32.mrf.mxu0  ;;  %v845_v48 = vmul.f32 %v841_v37, %v841_v37 }
 0x3b4   :  { %v844_v27 = vmul.f32 %v840_v7, %v840_v7  ;;  %v825_v6 = vpop.f32.mrf.mxu1  ;;  %v847_v14 = vsel %vm162_vm8, %v843_v20, 0.0 }
 0x3b5   :  { %v846_v2 = vmul.f32 %v842_v39, %v842_v39  ;;  %v850_v18 = vsel %vm162_vm8, %v845_v48, 0.0 }
 0x3b6   :  { %v848_v42 = vsel %vm162_vm8, %v844_v27, 0.0 }
 0x3b7   :  { %v849_v30 = vadd.f32 %v848_v42, %v847_v14  ;;  %v852_v43 = vsel %vm162_vm8, %v846_v2, 0.0 }
 0x3b9   :  { %v851_v19 = vadd.f32 %v850_v18, %v849_v30 }
 0x3bb   :  { %v853_v53 = vadd.f32 %v852_v43, %v851_v19 }
 0x3bd   :  { %854 = vadd.xlane.f32.xlu1 %v853_v53 }
 0x446   :  { %v855_v45 = vpop.xlane.xlu1 %854 }
 0x447   :  { %v856_v40 = vrot.slane %v855_v45, 4 }
 0x449   :  { %v857_v15 = vadd.f32 %v856_v40, %v855_v45 }
 0x44b   :  { %v858_v49 = vrot.slane %v857_v15, 2 }
 0x44d   :  { %v859_v24 = vadd.f32 %v858_v49, %v857_v15 }
 0x44f   :  { %v860_v51 = vrot.slane %v859_v24, 1 }
 0x451   :  { %v861_v52 = vadd.f32 %v860_v51, %v859_v24 }
 0x453   :  { %944 = vpush %v861_v52 }
 0x454   :  { %946 = vpush %v887_v54 }
 0x484   :  { %s945_s15 = spop %944 }
 0x485   :  { %s865_s16 = smul.f32 0.00048828125, %s945_s15  ;;  %s947_s17 = spop %946 }
 0x486   :  { %s891_s18 = smul.f32 0.001953125, %s947_s17 }
 0x488   :  { %s892_s19 = smul.f32 %s891_s18, %s865_s16 }
 0x48a   :  { %894 = sst [smem:[#allocation5]] %s892_s19 }
 0x48b   :  { %902 = dma.smem_to_hbm %s1004_s20, 16, %s1328_s5, [#allocation3]  }
 0x48c   :  { %997 = dma.done.wait [#allocation3], 16  }
 0x48d   :  { %998 = vsyncadd [#allocation3], 4294967280 }
 0x48e   :  { %906 = sfence }
 0x48f   :  { %907 = vsyncpa [#allocation3], 1 }
 0x490   :  { %908 = vsyncpa [#allocation4], 1 }

</bundles_post_ra>
